<compile_context>
chip_gen: v6e
topology: v6e:2x2x1
jax: 0.10.0
libtpu: 0.0.40
codegen_flags: <defaults>
</compile_context>

<pallas_src>
import jax
import jax.numpy as jnp
from jax.experimental import pallas as pl
from jax.experimental.pallas import tpu as pltpu

EPS = 1e-5   # torch.nn.LayerNorm default
LANE = 128


def _round_up(a, b):
    return ((a + b - 1) // b) * b


def _prenorm_kernel(x_ref, g_ref, b_ref, w_ref, fb_ref, o_ref, y_ref):
    # x_ref: (tm, D); g/b: (1, D) f32; w: (D, tn) bf16; fb: (1, tn) f32
    # y_ref: (tm, D) bf16 scratch holding the normalized rows.

    # LayerNorm once per row tile (only at the first column tile); reused for
    # every j > 0 of the same row tile via the persistent VMEM scratch.
    @pl.when(pl.program_id(1) == 0)
    def _():
        x = x_ref[...].astype(jnp.float32)
        g = g_ref[...].astype(jnp.float32)
        b = b_ref[...].astype(jnp.float32)
        mean = jnp.mean(x, axis=-1, keepdims=True)
        xc = x - mean
        var = jnp.mean(xc * xc, axis=-1, keepdims=True)   # centered, like torch
        inv = jax.lax.rsqrt(var + EPS)
        y_ref[...] = (xc * inv * g + b).astype(y_ref.dtype)

    # fn(.) = Linear(D, H) tile: bf16 MXU operands, f32 accumulation.
    out = jnp.dot(y_ref[...], w_ref[...], preferred_element_type=jnp.float32)
    out = out + fb_ref[...].astype(jnp.float32)
    o_ref[...] = out.astype(o_ref.dtype)


def _vmem_budget_bytes():
    """Per-generation scoped-VMEM budget (never exceeds physical VMEM)."""
    try:
        info = pltpu.get_tpu_info()
        cap = int(getattr(info, "vmem_capacity_bytes", 64 * 2**20))
    except Exception:
        cap = 64 * 2**20  # conservative (v7x-sized) fallback
    # Leave headroom for Mosaic internal scratch; cap below 128 MiB parts' max.
    return max(32 * 2**20, min(cap - 16 * 2**20, 100 * 2**20))


def _tile_bytes(tm, tn, D, x_itemsize, out_itemsize):
    """Worst-case VMEM footprint for one grid step (double-buffered blocks)."""
    return (2 * tm * D * x_itemsize        # x row tile
            + 2 * D * tn * 2               # bf16 weight tile
            + 2 * tm * tn * out_itemsize   # output tile
            + tm * D * 2                   # LN scratch (bf16)
            + 4 * D * 4 + 2 * tn * 4)      # gamma, beta, fn bias


def prenorm(x, gamma, beta, w, fb, *, tm=None, tn=None):
    """PreNorm(fn=Linear): x (B, N, D) -> (B, N, H), H = w.shape[1]."""
    B, N, D = x.shape
    H = w.shape[1]
    R = B * N
    x2 = x.reshape(R, D)

    x_itemsize = jnp.dtype(x.dtype).itemsize
    out_itemsize = x_itemsize
    budget = _vmem_budget_bytes()
    usable = budget - 4 * 2**20   # margin for compiler-internal scratch

    # --- row tiling ---------------------------------------------------------
    granule = max(8, 32 // x_itemsize)              # 8 f32, 16 bf16, 32 int8
    tm_target = tm if tm is not None else 512
    tm_eff = min(_round_up(tm_target, granule), _round_up(R, granule))

    # --- column tiling: prefer a fully resident weight slab ------------------
    Hp = _round_up(H, LANE)                         # lane-dense output width
    if tn is not None:
        candidates = [min(_round_up(tn, LANE), Hp)]
    else:
        candidates = [Hp] + [c for c in (512, 256, 128) if c < Hp and Hp % c == 0]
    tn_eff = None
    for cand in candidates:
        if _tile_bytes(tm_eff, cand, D, x_itemsize, out_itemsize) <= usable:
            tn_eff = cand
            break
    if tn_eff is None:
        tn_eff = LANE
        while (tm_eff > granule and
               _tile_bytes(tm_eff, tn_eff, D, x_itemsize, out_itemsize) > usable):
            tm_eff = max(granule, _round_up(tm_eff // 2, granule))
    Hp = _round_up(Hp, tn_eff)

    # --- parameter prep -------------------------------------------------------
    gamma2 = gamma.reshape(1, D).astype(jnp.float32)
    beta2 = beta.reshape(1, D).astype(jnp.float32)
    if Hp == H:
        # Lane-aligned: no pad copy, no output slice.
        w_p = w.astype(jnp.bfloat16)
        fb_p = fb.reshape(1, H).astype(jnp.float32)
    else:
        w_p = jnp.zeros((D, Hp), dtype=jnp.bfloat16).at[:, :H].set(
            w.astype(jnp.bfloat16))
        fb_p = jnp.zeros((1, Hp), dtype=jnp.float32).at[:, :H].set(
            fb.reshape(1, H).astype(jnp.float32))

    grid = (pl.cdiv(R, tm_eff), Hp // tn_eff)

    cost = pl.CostEstimate(
        flops=2 * R * D * Hp,
        transcendentals=R,                       # one rsqrt per row
        bytes_accessed=(x2.size * x_itemsize
                        + D * Hp * 2
                        + R * Hp * out_itemsize),
    )

    out2 = pl.pallas_call(
        _prenorm_kernel,
        out_shape=jax.ShapeDtypeStruct((R, Hp), x.dtype),
        grid_spec=pltpu.PrefetchScalarGridSpec(
            num_scalar_prefetch=0,
            grid=grid,
            in_specs=[
                pl.BlockSpec((tm_eff, D), lambda i, j: (i, 0)),   # x rows
                pl.BlockSpec((1, D), lambda i, j: (0, 0)),        # LN gamma
                pl.BlockSpec((1, D), lambda i, j: (0, 0)),        # LN beta
                pl.BlockSpec((D, tn_eff), lambda i, j: (0, j)),   # fn weight
                pl.BlockSpec((1, tn_eff), lambda i, j: (0, j)),   # fn bias
            ],
            out_specs=pl.BlockSpec((tm_eff, tn_eff), lambda i, j: (i, j)),
            scratch_shapes=[pltpu.VMEM((tm_eff, D), jnp.bfloat16)],  # LN cache
        ),
        compiler_params=pltpu.CompilerParams(
            dimension_semantics=("parallel", "arbitrary"),
            vmem_limit_bytes=int(budget),
        ),
        cost_estimate=cost,
    )(x2, gamma2, beta2, w_p, fb_p)

    if Hp != H:
        out2 = out2[:, :H]
    return out2.reshape(B, N, H)


if __name__ == "__main__":
    # Small shapes consistent with a ViT block: batch=2, seq=8, dim=32.
    B, N, D = 2, 8, 32
    H = D  # fn = Linear(dim, dim)

    key = jax.random.PRNGKey(0)
    kx, kw, kb = jax.random.split(key, 3)

    x = jax.random.normal(kx, (B, N, D), dtype=jnp.float32)

    # nn.LayerNorm init: weight=1, bias=0.
    gamma = jnp.ones((D,), dtype=jnp.float32)
    beta = jnp.zeros((D,), dtype=jnp.float32)
    # fn = Linear(D, H) with deterministic random weights.
    w = jax.random.normal(kw, (D, H), dtype=jnp.float32) * 0.02
    fb = jax.random.normal(kb, (H,), dtype=jnp.float32) * 0.02

    out = prenorm(x, gamma, beta, w, fb)
    out = jax.block_until_ready(out)

    # Pure-JAX f32 reference (kernel uses bf16 MXU operands -> looser tolerance).
    mean = jnp.mean(x, axis=-1, keepdims=True)
    var = jnp.mean((x - mean) ** 2, axis=-1, keepdims=True)
    y_ref = (x - mean) * jax.lax.rsqrt(var + EPS) * gamma + beta
    ref = jnp.einsum("bnd,dh->bnh", y_ref, w) + fb

    assert out.shape == (B, N, H)
    assert jnp.allclose(out, ref, atol=2e-2, rtol=2e-2), (
        float(jnp.max(jnp.abs(out - ref))))

    print("KERNEL_OK")
</pallas_src>

<mosaic_0001>
module attributes {stable_mosaic.version = 11 : i64} {
  func.func @_prenorm_kernel(%arg0: i32, %arg1: i32, %arg2: memref<16x32xf32, #tpu.memory_space<vmem>>, %arg3: memref<1x32xf32, #tpu.memory_space<vmem>>, %arg4: memref<1x32xf32, #tpu.memory_space<vmem>>, %arg5: memref<32x128xbf16, #tpu.memory_space<vmem>>, %arg6: memref<1x128xf32, #tpu.memory_space<vmem>>, %arg7: memref<16x128xf32, #tpu.memory_space<vmem>>, %arg8: memref<16x32xbf16, #tpu.memory_space<vmem>>) attributes {dimension_semantics = [#tpu.dimension_semantics<parallel>, #tpu.dimension_semantics<arbitrary>], iteration_bounds = array<i64: 1, 1>, scalar_prefetch = 0 : i64, scratch_operands = 1 : i64, tpu.core_type = #tpu.core_type<tc>, window_params = [{transform_indices = @transform_0, window_bounds = array<i64: 16, 32>}, {pipeline_mode = #tpu.pipeline_mode<synchronous>, transform_indices = @transform_1, window_bounds = array<i64: 1, 32>}, {pipeline_mode = #tpu.pipeline_mode<synchronous>, transform_indices = @transform_2, window_bounds = array<i64: 1, 32>}, {transform_indices = @transform_3, window_bounds = array<i64: 32, 128>}, {transform_indices = @transform_4, window_bounds = array<i64: 1, 128>}, {transform_indices = @transform_5, window_bounds = array<i64: 16, 128>}]} {
    %c0_i32 = arith.constant 0 : i32
    %0 = arith.cmpi eq, %arg1, %c0_i32 : i32
    %1 = arith.extui %0 : i1 to i32
    %c0_i32_0 = arith.constant 0 : i32
    %2 = arith.cmpi ne, %1, %c0_i32_0 : i32
    scf.if %2 {
      %c0_8 = arith.constant 0 : index
      %c0_9 = arith.constant 0 : index
      %10 = vector.load %arg2[%c0_8, %c0_9] : memref<16x32xf32, #tpu.memory_space<vmem>>, vector<16x32xf32>
      %c0_10 = arith.constant 0 : index
      %c0_11 = arith.constant 0 : index
      %11 = vector.load %arg3[%c0_10, %c0_11] : memref<1x32xf32, #tpu.memory_space<vmem>>, vector<1x32xf32>
      %c0_12 = arith.constant 0 : index
      %c0_13 = arith.constant 0 : index
      %12 = vector.load %arg4[%c0_12, %c0_13] : memref<1x32xf32, #tpu.memory_space<vmem>>, vector<1x32xf32>
      %cst_14 = arith.constant dense<0.000000e+00> : vector<16xf32>
      %13 = vector.multi_reduction <add>, %10, %cst_14 [1] : vector<16x32xf32> to vector<16xf32>
      %14 = vector.shape_cast %13 : vector<16xf32> to vector<16x1xf32>
      %cst_15 = arith.constant 3.200000e+01 : f32
      %15 = vector.broadcast %cst_15 : f32 to vector<16x1xf32>
      %16 = arith.divf %14, %15 : vector<16x1xf32>
      %17 = vector.broadcast %16 : vector<16x1xf32> to vector<16x32xf32>
      %18 = arith.subf %10, %17 : vector<16x32xf32>
      %19 = arith.mulf %18, %18 : vector<16x32xf32>
      %cst_16 = arith.constant dense<0.000000e+00> : vector<16xf32>
      %20 = vector.multi_reduction <add>, %19, %cst_16 [1] : vector<16x32xf32> to vector<16xf32>
      %21 = vector.shape_cast %20 : vector<16xf32> to vector<16x1xf32>
      %cst_17 = arith.constant 3.200000e+01 : f32
      %22 = vector.broadcast %cst_17 : f32 to vector<16x1xf32>
      %23 = arith.divf %21, %22 : vector<16x1xf32>
      %cst_18 = arith.constant 9.99999974E-6 : f32
      %24 = vector.broadcast %cst_18 : f32 to vector<16x1xf32>
      %25 = arith.addf %23, %24 : vector<16x1xf32>
      %26 = math.rsqrt %25 : vector<16x1xf32>
      %27 = vector.broadcast %26 : vector<16x1xf32> to vector<16x32xf32>
      %28 = arith.mulf %18, %27 : vector<16x32xf32>
      %29 = vector.broadcast %11 : vector<1x32xf32> to vector<16x32xf32>
      %30 = arith.mulf %28, %29 : vector<16x32xf32>
      %31 = vector.broadcast %12 : vector<1x32xf32> to vector<16x32xf32>
      %32 = arith.addf %30, %31 : vector<16x32xf32>
      %33 = arith.truncf %32 : vector<16x32xf32> to vector<16x32xbf16>
      %c0_19 = arith.constant 0 : index
      %c0_20 = arith.constant 0 : index
      %34 = vector.load %arg8[%c0_19, %c0_20] : memref<16x32xbf16, #tpu.memory_space<vmem>>, vector<16x32xbf16>
      tpu.vector_store %arg8[%c0_19, %c0_20], %33 {strides = array<i32>} : memref<16x32xbf16, #tpu.memory_space<vmem>>, vector<16x32xbf16>,
    } else {
    }
    %c0 = arith.constant 0 : index
    %c0_1 = arith.constant 0 : index
    %3 = vector.load %arg8[%c0, %c0_1] : memref<16x32xbf16, #tpu.memory_space<vmem>>, vector<16x32xbf16>
    %c0_2 = arith.constant 0 : index
    %c0_3 = arith.constant 0 : index
    %4 = vector.load %arg5[%c0_2, %c0_3] : memref<32x128xbf16, #tpu.memory_space<vmem>>, vector<32x128xbf16>
    %cst = arith.constant dense<0.000000e+00> : vector<16x128xf32>
    %5 = tpu.matmul %3, %4, %cst {dimension_numbers = #tpu.dot_dimension_numbers<[1], [0], [0], [1], [0, 0, 1, 1], [], []>} : vector<16x32xbf16>, vector<32x128xbf16>, vector<16x128xf32> -> vector<16x128xf32>
    %c0_4 = arith.constant 0 : index
    %c0_5 = arith.constant 0 : index
    %6 = vector.load %arg6[%c0_4, %c0_5] : memref<1x128xf32, #tpu.memory_space<vmem>>, vector<1x128xf32>
    %7 = vector.broadcast %6 : vector<1x128xf32> to vector<16x128xf32>
    %8 = arith.addf %5, %7 : vector<16x128xf32>
    %c0_6 = arith.constant 0 : index
    %c0_7 = arith.constant 0 : index
    %9 = vector.load %arg7[%c0_6, %c0_7] : memref<16x128xf32, #tpu.memory_space<vmem>>, vector<16x128xf32>
    tpu.vector_store %arg7[%c0_6, %c0_7], %8 {strides = array<i32>} : memref<16x128xf32, #tpu.memory_space<vmem>>, vector<16x128xf32>,
    return
  }
  func.func @transform_0(%arg0: i32, %arg1: i32) -> (i32, i32) {
    %c0_i32 = arith.constant 0 : i32
    %c0_i32_0 = arith.constant 0 : i32
    return %arg0, %c0_i32 : i32, i32
  }
  func.func @transform_1(%arg0: i32, %arg1: i32) -> (i32, i32) {
    %c0_i32 = arith.constant 0 : i32
    %c0_i32_0 = arith.constant 0 : i32
    %c0_i32_1 = arith.constant 0 : i32
    return %c0_i32, %c0_i32_0 : i32, i32
  }
  func.func @transform_2(%arg0: i32, %arg1: i32) -> (i32, i32) {
    %c0_i32 = arith.constant 0 : i32
    %c0_i32_0 = arith.constant 0 : i32
    %c0_i32_1 = arith.constant 0 : i32
    return %c0_i32, %c0_i32_0 : i32, i32
  }
  func.func @transform_3(%arg0: i32, %arg1: i32) -> (i32, i32) {
    %c0_i32 = arith.constant 0 : i32
    %c0_i32_0 = arith.constant 0 : i32
    return %c0_i32, %arg1 : i32, i32
  }
  func.func @transform_4(%arg0: i32, %arg1: i32) -> (i32, i32) {
    %c0_i32 = arith.constant 0 : i32
    %c0_i32_0 = arith.constant 0 : i32
    return %c0_i32, %arg1 : i32, i32
  }
  func.func @transform_5(%arg0: i32, %arg1: i32) -> (i32, i32) {
    %c0_i32 = arith.constant 0 : i32
    return %arg0, %arg1 : i32, i32
  }
}

</mosaic_0001>

<bundles_post_ra>
// kernel: tpu_custom_call.1
= control target key start
LH: loop header
LB: loop body
LE: loop exit
PB: predicated region body
PF: predicated region fallthrough
CT: control target
= control target key end

     0   :  { %10 = vsyncpa [#allocation4], 0  ;;  %s380_s0 = inlined_call_operand.hbm [shape: f32[16,32], index: 0, kind: input, shape index: {}]   ;;  %s381_s1 = inlined_call_operand.vmem [shape: f32[1,32], index: 1, kind: input, shape index: {}]   ;;  %s382_s2 = inlined_call_operand.vmem [shape: f32[1,32], index: 2, kind: input, shape index: {}]   ;;  %s383_s3 = inlined_call_operand.hbm [shape: bf16[32,128], index: 3, kind: input, shape index: {}]   ;;  %s384_s4 = inlined_call_operand.vmem [shape: f32[1,128], index: 4, kind: input, shape index: {}]   ;;  %s385_s5 = inlined_call_operand.hbm [shape: f32[16,128], index: 5, kind: output, shape index: {}]  }
   0x1   :  { %11 = vsyncpa [#allocation7], 0 }
   0x2   :  { %12 = vsyncpa [#allocation5], 0  ;;  %s312_s18 = smov [#allocation3]  }
   0x3   :  { %s18_s19 = sshll.u32 %s312_s18, 4  ;;  %s19_s19 = int_to_ptr.vmem [resolvable:$true] %s18_s19 }
   0x4   :  { %s254_s20 = scalar_lea.vmem %s19_s19, 256  ;;  %p259_p1 = scmp.lt.s32.totalorder %s19_s19, %s19_s19 }
   0x5   :  { %p255_p0 = scmp.ne.s32.totalorder %s19_s19, %s254_s20  ;;  %p260_p2 = scmp.lt.s32.totalorder %s254_s20, %s254_s20 }
   0x7   :  { %p261_p3 = por %p260_p2, %p259_p1 }
   0x9   :  { %p262_p4 = pnand %p261_p3, %p255_p0 }
   0xb   :  { %265 = shalt.err (!%p262_p4)
}
   0xc   :  { %s313_s21 = smov 128   ;;  %s314_s22 = smov 8  }
   0xd   :  { %24 = dma.hbm_to_vmem [thread:$0]  %s380_s0, 256, %s19_s19, [#allocation4], %s313_s21, %s313_s21, %s314_s22  }
   0xe   :  { %s315_s25 = smov [#allocation6]  }
   0xf   :  { %s34_s26 = sshll.u32 %s315_s25, 4  ;;  %s35_s26 = int_to_ptr.vmem [resolvable:$true] %s34_s26 }
  0x10   :  { %s274_s27 = scalar_lea.vmem %s35_s26, 256  ;;  %p279_p6 = scmp.lt.s32.totalorder %s35_s26, %s35_s26 }
  0x11   :  { %p275_p5 = scmp.ne.s32.totalorder %s35_s26, %s274_s27  ;;  %p280_p7 = scmp.lt.s32.totalorder %s274_s27, %s274_s27 }
  0x13   :  { %p281_p8 = por %p280_p7, %p279_p6 }
  0x15   :  { %p282_p9 = pnand %p281_p8, %p275_p5 }
  0x17   :  { %285 = shalt.err (!%p282_p9)
}
  0x18   :  { %s316_s28 = smov 64   ;;  %s317_s29 = smov 4  }
  0x19   :  { %40 = dma.hbm_to_vmem [thread:$0]  %s383_s3, 256, %s35_s26, [#allocation7], %s316_s28, %s316_s28, %s317_s29  }
  0x1a   :  { %306 = dma.done.wait [#allocation4], 256  }
  0x1b   :  { %307 = vsyncadd [#allocation4], 4294967040 }
  0x1c   :  { %308 = dma.done.wait [#allocation7], 256  }
  0x1d   :  { %309 = vsyncadd [#allocation7], 4294967040  ;;  %vm58_vm0 = vcmask 261120   ;;  %v54_v0 = vld [vmem:[#allocation3] sm:$0xff]  ;;  %v55_v1 = vld [vmem:[#allocation3 + $0x8] sm:$0xff]  ;;  %v318_v15 = vmov 0.0  }
  0x1e   :  { %v59_v2 = vsel %vm58_vm0, %v54_v0, 0.0  ;;  %v62_v3 = vsel %vm58_vm0, %v55_v1, 0.0  ;;  %v239_v14 = vld [vmem:[#allocation6 + $0x8] sm:$0xff]   ;;  %222 = vmatprep.subr.bf16.mxu0 %v318_v15  ;;  %vm319_vm1 = vmmov 0   ;;  %v240_v16 = vld [vmem:[#allocation6] sm:$0xff]   ;;  %vm110_vm2 = vcmask 257024  }
  0x1f   :  { %60 = vadd.xlane.f32.xlu0 %v59_v2  ;;  %226 = vmatprep.mubr.msk.bf16.mxu0 %vm319_vm1, %v318_v15  ;;  %v208_v24 = vld [vmem:[%s381_s1] ss:$0 sm:$0xff] }
  0x20   :  { %223 = vmatpush3.bf16.msra.mxu0 %v239_v14  ;;  %v209_v26 = vld [vmem:[%s382_s2] ss:$0 sm:$0xff]  ;;  %s320_s2 = smov [#allocation8]  }
  0x21   :  { %224 = vmatprep.subr.bf16.mxu0 %v318_v15  ;;  %v212_v36 = vld [vmem:[%s384_s4] ss:$0 sm:$0xff]  ;;  %s195_s10 = sshll.u32 %s320_s2, 4  ;;  %s196_s10 = int_to_ptr.vmem [resolvable:$true] %s195_s10 }
  0x22   :  { %s286_s11 = scalar_lea.vmem %s196_s10, 256  ;;  %p291_p11 = scmp.lt.s32.totalorder %s196_s10, %s196_s10 }
  0x23   :  { %63 = vadd.xlane.f32.xlu0 %v62_v3  ;;  %p287_p10 = scmp.ne.s32.totalorder %s196_s10, %s286_s11  ;;  %p292_p12 = scmp.lt.s32.totalorder %s286_s11, %s286_s11 }
  0x24   :  { %225 = vmatpush3.bf16.msra.mxu0 %v240_v16 }
  0x25   :  { %p293_p13 = por %p292_p12, %p291_p11 }
  0x27   :  { %p294_p0 = pnand %p293_p13, %p287_p10 }
  0xa8   :  { %v61_v4 = vpop.xlane.xlu0 %60 }
  0xa9   :  { %v66_v5 = vmul.f32 0.03125, %v61_v4 }
  0xab   :  { %v68_v6 = vsub.f32 %v54_v0, %v66_v5 }
  0xac   :  { %v64_v7 = vpop.xlane.xlu0 %63 }
  0xad   :  { %v67_v8 = vmul.f32 0.03125, %v64_v7  ;;  %v70_v9 = vmul.f32 %v68_v6, %v68_v6 }
  0xaf   :  { %v69_v10 = vsub.f32 %v55_v1, %v67_v8  ;;  %v72_v11 = vsel %vm58_vm0, %v70_v9, 0.0 }
  0xb0   :  { %73 = vadd.xlane.f32.xlu1 %v72_v11 }
  0xb1   :  { %v71_v12 = vmul.f32 %v69_v10, %v69_v10 }
  0xb3   :  { %v75_v13 = vsel %vm58_vm0, %v71_v12, 0.0 }
  0xb4   :  { %76 = vadd.xlane.f32.xlu1 %v75_v13 }
 0x139   :  { %v74_v17 = vpop.xlane.xlu1 %73 }
 0x13a   :  { %v78_v18 = vmul.f32 0.03125, %v74_v17 }
 0x13c   :  { %v80_v19 = vadd.f32 1e-05, %v78_v18 }
 0x13d   :  { %v77_v20 = vpop.xlane.xlu1 %76 }
 0x13e   :  { %242 = vrsqrt.f32 %v80_v19  ;;  %v79_v21 = vmul.f32 0.03125, %v77_v20 }
 0x140   :  { %v81_v22 = vadd.f32 1e-05, %v79_v21 }
 0x142   :  { %244 = vrsqrt.f32 %v81_v22 }
 0x14b   :  { %v243_v23 = vpop.eup %242 }
 0x14c   :  { %v84_v25 = vmul.f32 %v243_v23, %v68_v6 }
 0x14e   :  { %v92_v27 = vmul.f32 %v208_v24, %v84_v25 }
 0x14f   :  { %v245_v28 = vpop.eup %244 }
 0x150   :  { %v100_v29 = vadd.f32 %v209_v26, %v92_v27  ;;  %v85_v30 = vmul.f32 %v245_v28, %v69_v10 }
 0x152   :  { %v217_v31 = vpack.c.bf16 %v100_v29, %v100_v29  ;;  %v93_v32 = vmul.f32 %v208_v24, %v85_v30 }
 0x154   :  { %111 = vst.msk [vmem:[#allocation2] sm:$0xf] %vm110_vm2, %v217_v31  ;;  %v101_v33 = vadd.f32 %v209_v26, %v93_v32 }
 0x156   :  { %v218_v34 = vpack.c.bf16 %v101_v33, %v101_v33 }
 0x158   :  { %112 = vst.msk [vmem:[#allocation2 + $0x4] sm:$0xf] %vm110_vm2, %v218_v34 }
 0x15f   :  { %v241_v35 = vld [vmem:[#allocation2] sm:$0xff]  }
 0x160   :  { %227 = vmatmul.mubr.msk.bf16.vlgmr.msra.gmra.mxu0 %vm58_vm0, %v241_v35 }
 0x220   :  { %v181_v37 = vpop.f32.mrf.mxu0 }
 0x221   :  { %v182_v38 = vadd.f32 %v212_v36, %v181_v37 }
 0x222   :  { %v228_v39 = vpop.f32.mrf.mxu0 }
 0x223   :  { %188 = vst [vmem:[#allocation8] sm:$0xff] %v182_v38 }
 0x224   :  { %v184_v40 = vpop.f32.mrf.mxu0 }
 0x225   :  { %v185_v41 = vadd.f32 %v212_v36, %v184_v40 }
 0x226   :  { %v229_v42 = vpop.f32.mrf.mxu0 }
 0x227   :  { %189 = vst [vmem:[#allocation8 + $0x8] sm:$0xff] %v185_v41 }
 0x228   :  { %297 = shalt.err (!%p294_p0)
}
 0x229   :  { %201 = dma.vmem_to_hbm [thread:$0]  %s196_s10, 256, %s385_s5, [#allocation5], %s313_s21, %s313_s21, %s314_s22  }
 0x22a   :  { %310 = dma.done.wait [#allocation5], 256  }
 0x22b   :  { %311 = vsyncadd [#allocation5], 4294967040 }
 0x22c   :  { %205 = vsyncpa [#allocation4], 1 }
 0x22d   :  { %206 = vsyncpa [#allocation7], 1 }
 0x22e   :  { %207 = vsyncpa [#allocation5], 1 }

</bundles_post_ra>
